<compile_context>
chip_gen: v7x
topology: tpu7x:2x2x1
jax: 0.10.0
libtpu: 0.0.40
codegen_flags: <defaults>
</compile_context>

<pallas_src>
import jax
import jax.numpy as jnp
from jax import lax
from jax.experimental import pallas as pl
from jax.experimental.pallas import tpu as pltpu


def _round_up(x, m):
    return (x + m - 1) // m * m


def _chunk_len(t_pad, b_pad, target_rows=2048):
    """Largest divisor of t_pad whose row-slab (chunk * b_pad) <= target_rows."""
    cap = max(1, target_rows // max(b_pad, 1))
    best = 1
    for k in range(1, t_pad + 1):
        if t_pad % k == 0 and k <= cap:
            best = k
    return best


def _compiler_params(semantics, bytes_est):
    limit = int(min(48 * 1024 * 1024, max(32 * 1024 * 1024, 2 * bytes_est)))
    return pltpu.CompilerParams(dimension_semantics=semantics,
                                vmem_limit_bytes=limit)


# ---------------------------------------------------------------------------
# Kernel 1: hoisted input-to-hidden GEMM for the first GRU layer.
# ---------------------------------------------------------------------------
def _gx_kernel(x_ref, w_ref, b_ref, gx_ref):
    tc, bb, in_size = x_ref.shape
    x2 = x_ref[...].reshape(tc * bb, in_size).astype(jnp.bfloat16)
    g = jnp.dot(x2, w_ref[...], preferred_element_type=jnp.float32) + b_ref[...]
    gx_ref[...] = g.reshape(tc, bb, -1)


def _input_gemm(x_tm, w_bf16, bias_f32, th):
    """gx = x @ W_ih1 + b_ih1 for all timesteps. x_tm: (T_pad, B_pad, In)."""
    t_pad, b_pad, in_size = x_tm.shape
    g = w_bf16.shape[1]
    bytes_est = 4 * 2 * th * b_pad * (in_size + g) + 2 * in_size * g + 4 * g
    return pl.pallas_call(
        _gx_kernel,
        out_shape=jax.ShapeDtypeStruct((t_pad, b_pad, g), jnp.float32),
        grid=(t_pad // th,),
        in_specs=[
            pl.BlockSpec((th, b_pad, in_size), lambda c: (c, 0, 0)),
            pl.BlockSpec((in_size, g), lambda c: (0, 0)),
            pl.BlockSpec((1, g), lambda c: (0, 0)),
        ],
        out_specs=pl.BlockSpec((th, b_pad, g), lambda c: (c, 0, 0)),
        compiler_params=_compiler_params(("parallel",), bytes_est),
    )(x_tm, w_bf16, bias_f32)


# ---------------------------------------------------------------------------
# Kernel 2: fused multi-layer GRU recurrence, Tc timesteps per grid step.
# ---------------------------------------------------------------------------
def _make_gru_kernel(num_layers, tc, h_pad):
    g = 3 * h_pad

    def kernel(len_ref, gx1_ref, wih_ref, bih_ref, whh_ref, bhh_ref,
               y_ref, h_scr, act_scr, gx_scr):
        c = pl.program_id(1)

        @pl.when(c == 0)
        def _():
            h_scr[...] = jnp.zeros_like(h_scr)

        t0 = c * tc
        len_col = len_ref[...]                              # (Bb, 1) int32

        for l in range(num_layers):
            if l == 0:
                gx_src = gx1_ref                            # pipelined HBM block
            else:
                a = act_scr[...]                            # prev layer chunk out
                bb = a.shape[1]
                a2 = a.reshape(tc * bb, h_pad).astype(jnp.bfloat16)
                gx = jnp.dot(a2, wih_ref[l - 1],
                             preferred_element_type=jnp.float32)
                gx_scr[...] = gx.reshape(tc, bb, g) + bih_ref[l - 1]
                gx_src = gx_scr

            w_hh = whh_ref[l]                               # (H_pad, 3*H_pad) bf16
            b_hh = bhh_ref[l]                               # (1, 3*H_pad) f32

            def step(s, h, gx_src=gx_src, w_hh=w_hh, b_hh=b_hh):
                gx_t = gx_src[s]                            # (Bb, 3*H_pad) f32
                gh = jnp.dot(h.astype(jnp.bfloat16), w_hh,
                             preferred_element_type=jnp.float32) + b_hh
                # PyTorch GRU gate order [r, z, n]; gates are 128-lane aligned.
                r = jax.nn.sigmoid(gx_t[:, :h_pad] + gh[:, :h_pad])
                z = jax.nn.sigmoid(gx_t[:, h_pad:2 * h_pad]
                                   + gh[:, h_pad:2 * h_pad])
                n = jnp.tanh(gx_t[:, 2 * h_pad:] + r * gh[:, 2 * h_pad:])
                h_new = (1.0 - z) * n + z * h
                valid = (t0 + s) < len_col                  # (Bb, 1) bool
                h_next = jnp.where(valid, h_new, h)         # freeze past length
                act_scr[s] = jnp.where(valid, h_next, 0.0)  # zeros at pads
                return h_next

            h_scr[l] = lax.fori_loop(0, tc, step, h_scr[l], unroll=True)

        y_ref[...] = act_scr[...]                           # final layer only

    return kernel


def _gru_stack(gx1, len_col, wih_rest, bih_rest, whh_all, bhh_all, *, tc, nb):
    t_pad, b_pad, g = gx1.shape
    h_pad = g // 3
    num_layers = whh_all.shape[0]
    lm1 = wih_rest.shape[0]
    bb = b_pad // nb
    nt = t_pad // tc

    kernel = _make_gru_kernel(num_layers, tc, h_pad)
    bytes_est = 4 * (2 * tc * bb * g + 2 * tc * bb * h_pad
                     + num_layers * bb * h_pad + tc * bb * h_pad + tc * bb * g)
    bytes_est += 2 * (num_layers + lm1) * h_pad * g + 4 * (num_layers + lm1) * g
    return pl.pallas_call(
        kernel,
        out_shape=jax.ShapeDtypeStruct((t_pad, b_pad, h_pad), jnp.float32),
        grid=(nb, nt),
        in_specs=[
            pl.BlockSpec((bb, 1), lambda b, c: (b, 0)),                    # lengths
            pl.BlockSpec((tc, bb, g), lambda b, c: (c, b, 0)),             # gx layer 1
            pl.BlockSpec((lm1, h_pad, g), lambda b, c: (0, 0, 0)),         # W_ih l>=2
            pl.BlockSpec((lm1, 1, g), lambda b, c: (0, 0, 0)),             # b_ih l>=2
            pl.BlockSpec((num_layers, h_pad, g), lambda b, c: (0, 0, 0)),  # W_hh
            pl.BlockSpec((num_layers, 1, g), lambda b, c: (0, 0, 0)),      # b_hh
        ],
        out_specs=pl.BlockSpec((tc, bb, h_pad), lambda b, c: (c, b, 0)),
        scratch_shapes=[
            pltpu.VMEM((num_layers, bb, h_pad), jnp.float32),  # carried h per layer
            pltpu.VMEM((tc, bb, h_pad), jnp.float32),          # chunk activations
            pltpu.VMEM((tc, bb, g), jnp.float32),              # chunk gx (layers >= 2)
        ],
        compiler_params=_compiler_params(("parallel", "arbitrary"), bytes_est),
    )(len_col, gx1, wih_rest, bih_rest, whh_all, bhh_all)


# ---------------------------------------------------------------------------
# Kernel 3: fused lane-dense heads (means | vars | softmax(categorical)).
# ---------------------------------------------------------------------------
def _heads_kernel(y_ref, w_ref, b_ref, mv_ref, cat_ref):
    th, bb, h_pad = y_ref.shape
    mv_w = mv_ref.shape[-1]
    y2 = y_ref[...].reshape(th * bb, h_pad).astype(jnp.bfloat16)
    full = jnp.dot(y2, w_ref[...], preferred_element_type=jnp.float32) + b_ref[...]
    mv_ref[...] = full[:, :mv_w].reshape(th, bb, mv_w)
    logits = full[:, mv_w:]                       # pad cols carry -1e30 bias
    logits = logits - jnp.max(logits, axis=-1, keepdims=True)
    e = jnp.exp(logits)
    p = e * pl.reciprocal(jnp.sum(e, axis=-1, keepdims=True), approx=True)
    cat_ref[...] = p.reshape(th, bb, -1)


def _heads(y, w_all_bf16, b_all_f32, mv_pad, cat_pad, th):
    t_pad, b_pad, h_pad = y.shape
    w_tot = mv_pad + cat_pad
    bytes_est = 4 * 2 * th * b_pad * (h_pad + w_tot) + 2 * h_pad * w_tot + 4 * w_tot
    return pl.pallas_call(
        _heads_kernel,
        out_shape=(
            jax.ShapeDtypeStruct((t_pad, b_pad, mv_pad), jnp.float32),
            jax.ShapeDtypeStruct((t_pad, b_pad, cat_pad), jnp.float32),
        ),
        grid=(t_pad // th,),
        in_specs=[
            pl.BlockSpec((th, b_pad, h_pad), lambda c: (c, 0, 0)),
            pl.BlockSpec((h_pad, w_tot), lambda c: (0, 0)),
            pl.BlockSpec((1, w_tot), lambda c: (0, 0)),
        ],
        out_specs=(
            pl.BlockSpec((th, b_pad, mv_pad), lambda c: (c, 0, 0)),
            pl.BlockSpec((th, b_pad, cat_pad), lambda c: (c, 0, 0)),
        ),
        compiler_params=_compiler_params(("parallel",), bytes_est),
    )(y, w_all_bf16, b_all_f32)


# ---------------------------------------------------------------------------
# Weight packing (lane-aligned gates, padded hidden, bf16 MXU inputs).
# ---------------------------------------------------------------------------
def _pack_gru_params(gru_params, h, h_pad):
    g = 3 * h_pad

    def pad_gate_cols(w):      # (rows, 3H) -> (rows, 3*H_pad), gates lane-aligned
        rows = w.shape[0]
        return jnp.pad(w.reshape(rows, 3, h),
                       ((0, 0), (0, 0), (0, h_pad - h))).reshape(rows, g)

    def pad_bias(b):           # (1, 3H) -> (1, 3*H_pad)
        return jnp.pad(b.reshape(1, 3, h),
                       ((0, 0), (0, 0), (0, h_pad - h))).reshape(1, g)

    whh_all, bhh_all, wih_rest, bih_rest = [], [], [], []
    wih0 = bih0 = None
    for li, layer in enumerate(gru_params):
        whh = jnp.pad(pad_gate_cols(layer["whh_t"]), ((0, h_pad - h), (0, 0)))
        whh_all.append(whh.astype(jnp.bfloat16))
        bhh_all.append(pad_bias(layer["bhh"]))
        wih = pad_gate_cols(layer["wih_t"])
        bih = pad_bias(layer["bih"])
        if li == 0:
            wih0 = wih.astype(jnp.bfloat16)                  # (In, G)
            bih0 = bih
        else:
            wih = jnp.pad(wih, ((0, h_pad - h), (0, 0)))      # (H_pad, G)
            wih_rest.append(wih.astype(jnp.bfloat16))
            bih_rest.append(bih)

    whh_all = jnp.stack(whh_all)                              # (L, H_pad, G)
    bhh_all = jnp.stack(bhh_all)                              # (L, 1, G)
    if wih_rest:
        wih_rest = jnp.stack(wih_rest)                        # (L-1, H_pad, G)
        bih_rest = jnp.stack(bih_rest)                        # (L-1, 1, G)
    else:
        wih_rest = jnp.zeros((1, h_pad, g), jnp.bfloat16)     # unused dummy
        bih_rest = jnp.zeros((1, 1, g), jnp.float32)
    return wih0, bih0, wih_rest, bih_rest, whh_all, bhh_all


def _pack_head_params(params, h, h_pad, k, bn):
    mv = 2 * k * bn
    mv_pad = _round_up(mv, 128)
    cat_pad = _round_up(k, 128)
    w_mv = jnp.concatenate([params["wm_t"], params["wv_t"]], axis=1)
    w_mv = jnp.pad(w_mv, ((0, h_pad - h), (0, mv_pad - mv)))
    w_cat = jnp.pad(params["wc_t"], ((0, h_pad - h), (0, cat_pad - k)))
    w_all = jnp.concatenate([w_mv, w_cat], axis=1).astype(jnp.bfloat16)
    b_mv = jnp.pad(jnp.concatenate([params["bm"], params["bv"]], axis=1),
                   ((0, 0), (0, mv_pad - mv)))
    b_cat = jnp.pad(params["bc"], ((0, 0), (0, cat_pad - k)),
                    constant_values=-1e30)                    # exp() -> 0 in softmax
    b_all = jnp.concatenate([b_mv, b_cat], axis=1).astype(jnp.float32)
    return w_all, b_all, mv_pad, cat_pad


# ---------------------------------------------------------------------------
# Full forward pass.
# ---------------------------------------------------------------------------
def curl_encoder_forward(inputs, lengths, params, *, time_chunk=8):
    """JAX/Pallas equivalent of curlEncoder.forward.

    inputs : (B, T, input_size) float32, padded along T.
    lengths: (B,) int32 valid lengths (as given to pack_padded_sequence).
    params : dict with
      "gru"  : list of per-layer dicts {wih_t (In,3H), whh_t (H,3H),
                                        bih (1,3H),  bhh (1,3H)}   gates [r,z,n]
      "wc_t" (H, K), "bc" (1, K)
      "wm_t" (H, K*bn), "bm" (1, K*bn)
      "wv_t" (H, K*bn), "bv" (1, K*bn)
      "comp_num", "bn_size"
    Returns (cat, means, vars_) with shapes (B,T,K), (K,B,T,bn), (K,B,T,bn).
    """
    inputs = jnp.asarray(inputs, jnp.float32)
    lengths = jnp.asarray(lengths, jnp.int32)
    b, t, _ = inputs.shape
    k = int(params["comp_num"])
    bn = int(params["bn_size"])
    h = params["gru"][0]["whh_t"].shape[0]
    h_pad = _round_up(h, 128)

    # Padding: batch to sublane multiple (2 blocks when big enough), T to chunk.
    b_pad = _round_up(max(b, 8), 8)
    nb = 2 if (b_pad >= 16 and b_pad % 16 == 0) else 1        # v7x 2-TC batch split
    tc = max(1, min(time_chunk, t))
    t_pad = _round_up(t, tc)
    th = _chunk_len(t_pad, b_pad)                             # row tile for GEMMs

    x_tm = jnp.transpose(inputs, (1, 0, 2))                   # (T, B, In)
    x_tm = jnp.pad(x_tm, ((0, t_pad - t), (0, b_pad - b), (0, 0)))
    len_col = jnp.pad(lengths, (0, b_pad - b)).reshape(b_pad, 1)

    wih0, bih0, wih_rest, bih_rest, whh_all, bhh_all = _pack_gru_params(
        params["gru"], h, h_pad)
    w_heads, b_heads, mv_pad, cat_pad = _pack_head_params(params, h, h_pad, k, bn)

    gx1 = _input_gemm(x_tm, wih0, bih0, th)                   # (T_pad, B_pad, 3*H_pad)
    y = _gru_stack(gx1, len_col, wih_rest, bih_rest, whh_all, bhh_all,
                   tc=tc, nb=nb)                              # (T_pad, B_pad, H_pad)
    mv_full, cat_full = _heads(y, w_heads, b_heads, mv_pad, cat_pad, th)

    # TODO(synk): the (K,B,T,bn) consumer layout has bn (<128) as the minor dim,
    # so these final transposes stay in the XLA wrapper rather than the kernel.
    cat = jnp.transpose(cat_full[:t, :b, :k], (1, 0, 2))
    means = jnp.transpose(mv_full[:t, :b, :k * bn].reshape(t, b, k, bn),
                          (2, 1, 0, 3))
    vars_ = jnp.transpose(mv_full[:t, :b, k * bn:2 * k * bn].reshape(t, b, k, bn),
                          (2, 1, 0, 3))
    return cat, means, vars_


# ---------------------------------------------------------------------------
# Pure-JAX f32 reference (correctness check only).
# ---------------------------------------------------------------------------
def _reference_forward(inputs, lengths, params):
    inputs = jnp.asarray(inputs, jnp.float32)
    B, T, _ = inputs.shape
    comp_num = int(params["comp_num"])
    bn = int(params["bn_size"])
    mask = (jnp.arange(T)[None, :] < lengths[:, None]).astype(jnp.float32)

    y = inputs
    for layer in params["gru"]:
        H = layer["whh_t"].shape[0]
        h = jnp.zeros((B, H), jnp.float32)
        outs = []
        for t in range(T):
            gx = y[:, t, :] @ layer["wih_t"] + layer["bih"]
            gh = h @ layer["whh_t"] + layer["bhh"]
            r = jax.nn.sigmoid(gx[:, :H] + gh[:, :H])
            z = jax.nn.sigmoid(gx[:, H:2 * H] + gh[:, H:2 * H])
            n = jnp.tanh(gx[:, 2 * H:] + r * gh[:, 2 * H:])
            h_new = (1.0 - z) * n + z * h
            m = mask[:, t:t + 1]
            h = m * h_new + (1.0 - m) * h
            outs.append(m * h)
        y = jnp.stack(outs, axis=1)

    cat = jax.nn.softmax(y @ params["wc_t"] + params["bc"], axis=-1)
    means = (y @ params["wm_t"] + params["bm"]).reshape(B, T, comp_num, bn)
    vars_ = (y @ params["wv_t"] + params["bv"]).reshape(B, T, comp_num, bn)
    return cat, jnp.transpose(means, (2, 0, 1, 3)), jnp.transpose(vars_, (2, 0, 1, 3))


if __name__ == "__main__":
    B, T = 4, 8
    input_size, hidden_size, num_layers = 32, 32, 2
    bn_size, comp_num = 16, 4
    lengths = jnp.array([8, 6, 5, 3], dtype=jnp.int32)

    key = jax.random.PRNGKey(0)
    keys = iter(jax.random.split(key, 64))
    k = 1.0 / float(hidden_size) ** 0.5

    def uniform(rng, shape, scale):
        return jax.random.uniform(rng, shape, jnp.float32, -scale, scale)

    gru_params = []
    for in_size in [input_size] + [hidden_size] * (num_layers - 1):
        gru_params.append(dict(
            wih_t=uniform(next(keys), (in_size, 3 * hidden_size), k),
            whh_t=uniform(next(keys), (hidden_size, 3 * hidden_size), k),
            bih=uniform(next(keys), (1, 3 * hidden_size), k),
            bhh=uniform(next(keys), (1, 3 * hidden_size), k),
        ))
    params = dict(
        gru=gru_params,
        wc_t=uniform(next(keys), (hidden_size, comp_num), k),
        bc=uniform(next(keys), (1, comp_num), k),
        wm_t=uniform(next(keys), (hidden_size, comp_num * bn_size), k),
        bm=uniform(next(keys), (1, comp_num * bn_size), k),
        wv_t=uniform(next(keys), (hidden_size, comp_num * bn_size), k),
        bv=uniform(next(keys), (1, comp_num * bn_size), k),
        comp_num=comp_num, bn_size=bn_size,
    )

    inputs = jax.random.normal(next(keys), (B, T, input_size), jnp.float32)
    # padded positions are ignored by the packed path; zero them like pack would
    inputs = inputs * (jnp.arange(T)[None, :, None]
                       < lengths[:, None, None]).astype(jnp.float32)

    cat, means, vars_ = curl_encoder_forward(inputs, lengths, params)
    cat, means, vars_ = jax.block_until_ready((cat, means, vars_))

    # Shape / sanity checks matching the PyTorch module.
    assert cat.shape == (B, T, comp_num), cat.shape
    assert means.shape == (comp_num, B, T, bn_size), means.shape
    assert vars_.shape == (comp_num, B, T, bn_size), vars_.shape
    assert bool(jnp.all(jnp.isfinite(cat)))
    assert bool(jnp.all(jnp.isfinite(means)))
    assert bool(jnp.all(jnp.isfinite(vars_)))
    # approx reciprocal in softmax -> small slack on the sum-to-one check
    assert bool(jnp.allclose(jnp.sum(cat, axis=-1), 1.0, atol=5e-3))

    # Padded timestep (b=3, t=7; length=3) sees a zero hidden state -> bias only.
    assert bool(jnp.allclose(means[:, 3, 7, :],
                             params["bm"].reshape(comp_num, bn_size), atol=1e-5))

    # Pure-JAX f32 reference; kernels use bf16 MXU inputs -> relaxed tolerance.
    cat_r, means_r, vars_r = _reference_forward(inputs, lengths, params)
    assert bool(jnp.allclose(cat, cat_r, atol=3e-2, rtol=3e-2))
    assert bool(jnp.allclose(means, means_r, atol=3e-2, rtol=3e-2))
    assert bool(jnp.allclose(vars_, vars_r, atol=3e-2, rtol=3e-2))

    print("KERNEL_OK")
</pallas_src>

<mosaic_0001>
module attributes {stable_mosaic.version = 11 : i64} {
  func.func @_gx_kernel(%arg0: i32, %arg1: memref<8x8x32xf32, #tpu.memory_space<vmem>>, %arg2: memref<32x384xbf16, #tpu.memory_space<vmem>>, %arg3: memref<1x384xf32, #tpu.memory_space<vmem>>, %arg4: memref<8x8x384xf32, #tpu.memory_space<vmem>>) attributes {dimension_semantics = [#tpu.dimension_semantics<parallel>], iteration_bounds = array<i64: 1>, scalar_prefetch = 0 : i64, scratch_operands = 0 : i64, tpu.core_type = #tpu.core_type<tc>, window_params = [{transform_indices = @transform_0, window_bounds = array<i64: 8, 8, 32>}, {pipeline_mode = #tpu.pipeline_mode<synchronous>, transform_indices = @transform_1, window_bounds = array<i64: 32, 384>}, {pipeline_mode = #tpu.pipeline_mode<synchronous>, transform_indices = @transform_2, window_bounds = array<i64: 1, 384>}, {transform_indices = @transform_3, window_bounds = array<i64: 8, 8, 384>}]} {
    %c0 = arith.constant 0 : index
    %c0_0 = arith.constant 0 : index
    %c0_1 = arith.constant 0 : index
    %0 = vector.load %arg1[%c0, %c0_0, %c0_1] : memref<8x8x32xf32, #tpu.memory_space<vmem>>, vector<8x8x32xf32>
    %1 = vector.shape_cast %0 : vector<8x8x32xf32> to vector<64x32xf32>
    %2 = arith.truncf %1 : vector<64x32xf32> to vector<64x32xbf16>
    %c0_2 = arith.constant 0 : index
    %c0_3 = arith.constant 0 : index
    %3 = vector.load %arg2[%c0_2, %c0_3] : memref<32x384xbf16, #tpu.memory_space<vmem>>, vector<32x384xbf16>
    %cst = arith.constant dense<0.000000e+00> : vector<64x384xf32>
    %4 = tpu.matmul %2, %3, %cst {dimension_numbers = #tpu.dot_dimension_numbers<[1], [0], [0], [1], [0, 0, 1, 1], [], []>} : vector<64x32xbf16>, vector<32x384xbf16>, vector<64x384xf32> -> vector<64x384xf32>
    %c0_4 = arith.constant 0 : index
    %c0_5 = arith.constant 0 : index
    %5 = vector.load %arg3[%c0_4, %c0_5] : memref<1x384xf32, #tpu.memory_space<vmem>>, vector<1x384xf32>
    %6 = vector.broadcast %5 : vector<1x384xf32> to vector<64x384xf32>
    %7 = arith.addf %4, %6 : vector<64x384xf32>
    %8 = vector.shape_cast %7 : vector<64x384xf32> to vector<8x8x384xf32>
    %c0_6 = arith.constant 0 : index
    %c0_7 = arith.constant 0 : index
    %c0_8 = arith.constant 0 : index
    %9 = vector.load %arg4[%c0_6, %c0_7, %c0_8] : memref<8x8x384xf32, #tpu.memory_space<vmem>>, vector<8x8x384xf32>
    tpu.vector_store %arg4[%c0_6, %c0_7, %c0_8], %8 {strides = array<i32>} : memref<8x8x384xf32, #tpu.memory_space<vmem>>, vector<8x8x384xf32>,
    return
  }
  func.func @transform_0(%arg0: i32) -> (i32, i32, i32) {
    %c0_i32 = arith.constant 0 : i32
    %c0_i32_0 = arith.constant 0 : i32
    %c0_i32_1 = arith.constant 0 : i32
    return %arg0, %c0_i32, %c0_i32_0 : i32, i32, i32
  }
  func.func @transform_1(%arg0: i32) -> (i32, i32) {
    %c0_i32 = arith.constant 0 : i32
    %c0_i32_0 = arith.constant 0 : i32
    %c0_i32_1 = arith.constant 0 : i32
    return %c0_i32, %c0_i32_0 : i32, i32
  }
  func.func @transform_2(%arg0: i32) -> (i32, i32) {
    %c0_i32 = arith.constant 0 : i32
    %c0_i32_0 = arith.constant 0 : i32
    %c0_i32_1 = arith.constant 0 : i32
    return %c0_i32, %c0_i32_0 : i32, i32
  }
  func.func @transform_3(%arg0: i32) -> (i32, i32, i32) {
    %c0_i32 = arith.constant 0 : i32
    %c0_i32_0 = arith.constant 0 : i32
    %c0_i32_1 = arith.constant 0 : i32
    return %arg0, %c0_i32, %c0_i32_0 : i32, i32, i32
  }
}

</mosaic_0001>

<bundles_post_ra>
// kernel: tpu_custom_call.1
= control target key start
LH: loop header
LB: loop body
LE: loop exit
PB: predicated region body
PF: predicated region fallthrough
CT: control target
= control target key end

     0   :  { %8 = vsyncpa [#allocation3], 0  ;;  %s529_s0 = inlined_call_operand.hbm [shape: f32[8,8,32], index: 0, kind: input, shape index: {}]   ;;  %s530_s1 = inlined_call_operand.hbm [shape: bf16[32,384], index: 1, kind: input, shape index: {}]   ;;  %s531_s2 = inlined_call_operand.vmem [shape: f32[1,384], index: 2, kind: input, shape index: {}]   ;;  %s532_s3 = inlined_call_operand.hbm [shape: f32[8,8,384], index: 3, kind: output, shape index: {}]  }
   0x1   :  { %9 = vsyncpa [#allocation6], 0 }
   0x2   :  { %10 = vsyncpa [#allocation4], 0  ;;  %s432_s12 = smov [#allocation2]   ;;  %s360_s16 = scalar_lea.hbm %s529_s0, 1024 }
   0x3   :  { %s16_s13 = sshll.u32 %s432_s12, 4  ;;  %p361_p0 = scmp.ne.s32.totalorder %s529_s0, %s360_s16  ;;  %s17_s13 = int_to_ptr.vmem [resolvable:$true] %s16_s13 }
   0x4   :  { %p364_p1 = scmp.lt.u32.totalorder %s360_s16, %s529_s0 }
   0x6   :  { %p366_p2 = pnand %p364_p1, %p361_p0 }
   0x8   :  { %369 = shalt.err (!%p366_p2)
}
   0x9   :  { %s370_s21 = scalar_lea.vmem %s17_s13, 1024  ;;  %p375_p4 = scmp.lt.s32.totalorder %s17_s13, %s17_s13 }
   0xa   :  { %p371_p3 = scmp.ne.s32.totalorder %s17_s13, %s370_s21  ;;  %p376_p5 = scmp.lt.s32.totalorder %s370_s21, %s370_s21 }
   0xc   :  { %p377_p6 = por %p376_p5, %p375_p4 }
   0xe   :  { %p378_p7 = pnand %p377_p6, %p371_p3 }
  0x10   :  { %381 = shalt.err (!%p378_p7)
}
  0x11   :  { %s433_s22 = smov 128   ;;  %s434_s23 = smov 8  }
  0x12   :  { %22 = dma.hbm_to_vmem [thread:$0]  %s529_s0, 1024, %s17_s13, [#allocation3], %s433_s22, %s433_s22, %s434_s23  }
  0x13   :  { %s435_s26 = smov [#allocation5]   ;;  %s382_s30 = scalar_lea.hbm %s530_s1, 768 }
  0x14   :  { %s28_s27 = sshll.u32 %s435_s26, 4  ;;  %p383_p8 = scmp.ne.s32.totalorder %s530_s1, %s382_s30  ;;  %s29_s27 = int_to_ptr.vmem [resolvable:$true] %s28_s27 }
  0x15   :  { %p386_p9 = scmp.lt.u32.totalorder %s382_s30, %s530_s1 }
  0x17   :  { %p388_p10 = pnand %p386_p9, %p383_p8 }
  0x19   :  { %391 = shalt.err (!%p388_p10)
}
  0x1a   :  { %s392_s8 = scalar_lea.vmem %s29_s27, 768  ;;  %p397_p12 = scmp.lt.s32.totalorder %s29_s27, %s29_s27 }
  0x1b   :  { %p393_p11 = scmp.ne.s32.totalorder %s29_s27, %s392_s8  ;;  %p398_p13 = scmp.lt.s32.totalorder %s392_s8, %s392_s8 }
  0x1d   :  { %p399_p0 = por %p398_p13, %p397_p12 }
  0x1f   :  { %p400_p1 = pnand %p399_p0, %p393_p11 }
  0x21   :  { %403 = shalt.err (!%p400_p1)
}
  0x22   :  { %s436_s0 = smov 192   ;;  %s437_s9 = smov 12  }
  0x23   :  { %34 = dma.hbm_to_vmem [thread:$0]  %s530_s1, 768, %s29_s27, [#allocation6], %s436_s0, %s436_s0, %s437_s9  }
  0x24   :  { %426 = dma.done.wait [#allocation3], 1024  }
  0x25   :  { %427 = vsyncadd [#allocation3], 4294966272 }
  0x26   :  { %428 = dma.done.wait [#allocation6], 768  }
  0x27   :  { %429 = vsyncadd [#allocation6], 4294966528  ;;  %v438_v0 = vmov 0   ;;  %v352_v1 = vld [vmem:[#allocation5 + $0x4] ss:$12 sps:$4 sm:$0xff]   ;;  %v45_v6 = vld [vmem:[#allocation2 + $0x8] sm:$0xff]  ;;  %v66_v19 = vlaneseq }
  0x28   :  { %158 = vmatprep.mubr.bf16.mxu0 %v438_v0  ;;  %188 = vmatprep.mubr.bf16.mxu1 %v438_v0  ;;  %v354_v2 = vld [vmem:[#allocation5] ss:$12 sps:$4 sm:$0xff]   ;;  %v355_v3 = vld [vmem:[#allocation5 + $0x1c] ss:$12 sps:$4 sm:$0xff]   ;;  %v357_v4 = vld [vmem:[#allocation5 + $0x18] ss:$12 sps:$4 sm:$0xff]  }
  0x29   :  { %126 = vmatprep.subr.bf16.mxu0 %v352_v1  ;;  %338 = vmatprep.subr.bf16.mxu1 %v352_v1  ;;  %v44_v5 = vld [vmem:[#allocation2] sm:$0xff]  ;;  %v50_v7 = vld [vmem:[#allocation2 + $0x30] sm:$0xff]  ;;  %v51_v8 = vld [vmem:[#allocation2 + $0x38] sm:$0xff]  ;;  %vm113_vm0 = vcmask 261120   ;;  %v67_v20 = vshrl.u32 %v66_v19, 7 }
  0x2a   :  { %127 = vmatpush1.bf16.msra.mxu0 %v354_v2  ;;  %340 = vmatpush1.bf16.msra.mxu1 %v354_v2  ;;  %v358_v9 = vld [vmem:[#allocation5 + $0x8] ss:$12 sps:$4 sm:$0xff]   ;;  %v52_v10 = vpack.c.bf16 %v45_v6, %v44_v5  ;;  %v55_v11 = vpack.c.bf16 %v51_v8, %v50_v7  ;;  %v359_v12 = vld [vmem:[#allocation5 + $0x20] ss:$12 sps:$4 sm:$0xff]   ;;  %v47_v14 = vld [vmem:[#allocation2 + $0x18] sm:$0xff] }
  0x2b   :  { %128 = vmatprep.subr.bf16.mxu0 %v355_v3  ;;  %339 = vmatprep.subr.bf16.mxu1 %v355_v3  ;;  %v46_v13 = vld [vmem:[#allocation2 + $0x10] sm:$0xff]  ;;  %v48_v15 = vld [vmem:[#allocation2 + $0x20] sm:$0xff]  ;;  %v49_v16 = vld [vmem:[#allocation2 + $0x28] sm:$0xff]  ;;  %v68_v21 = vsub.s32 0, %v67_v20  ;;  %v72_v23 = vsub.s32 1, %v67_v20  ;;  %v76_v32 = vsub.s32 2, %v67_v20 }
  0x2c   :  { %v53_v17 = vpack.c.bf16 %v47_v14, %v46_v13  ;;  %v54_v18 = vpack.c.bf16 %v49_v16, %v48_v15  ;;  %v64_v22 = vld [vmem:[%s531_s2] sm:$0x7]  ;;  %s439_s2 = smov [#allocation7]  }
  0x2d   :  { %v497_v24 = vrot.slane %v64_v22, %v68_v21  ;;  %v499_v25 = vrot.slane %v64_v22, %v72_v23  ;;  %v77_v43 = vrot.slane %v64_v22, %v76_v32  ;;  %s293_s13 = sshll.u32 %s439_s2, 4  ;;  %s294_s13 = int_to_ptr.vmem [resolvable:$true] %s293_s13 }
  0x2e   :  { %129 = vmatpush1.bf16.msra.mxu0 %v357_v4  ;;  %341 = vmatpush1.bf16.msra.mxu1 %v357_v4  ;;  %s404_s14 = scalar_lea.vmem %s294_s13, 3072  ;;  %p409_p3 = scmp.lt.s32.totalorder %s294_s13, %s294_s13 }
  0x2f   :  { %326 = vmatprep.subr.bf16.mxu1 %v358_v9  ;;  %p405_p2 = scmp.ne.s32.totalorder %s294_s13, %s404_s14  ;;  %p410_p4 = scmp.lt.s32.totalorder %s404_s14, %s404_s14 }
  0x31   :  { %312 = vmatmul.mubr.msk.bf16.vlgmr.msra.gmra.mrb[0].mxu0 %vm113_vm0, %v52_v10  ;;  %315 = vmatmul.mubr.msk.bf16.vlgmr.msra.gmra.mrb[0].mxu1 %vm113_vm0, %v55_v11  ;;  %p411_p5 = por %p410_p4, %p409_p3 }
  0x32   :  { %327 = vmatpush3.bf16.msra.mxu1 %v358_v9  ;;  %168 = vmatprep.mubr.bf16.mxu0 %v438_v0 }
  0x33   :  { %328 = vmatprep.subr.bf16.mxu1 %v359_v12  ;;  %330 = vmatprep.mubr.msk.bf16.mxu1 %vm113_vm0, %v52_v10  ;;  %p412_p6 = pnand %p411_p5, %p405_p2 }
  0x36   :  { %329 = vmatpush3.bf16.msra.mxu1 %v359_v12 }
  0x39   :  { %313 = vmatmul.mubr.msk.bf16.gmra.mrb[4].mxu0 %vm113_vm0, %v53_v17  ;;  %331 = vmatmul.mubr.msk.bf16.vlgmr.msra.gmra.mrb[4].mxu1 %vm113_vm0, %v53_v17 }
  0x3a   :  { %178 = vmatprep.mubr.bf16.mxu0 %v438_v0  ;;  %334 = vmatprep.mubr.msk.bf16.mxu1 %vm113_vm0, %v54_v18 }
  0x41   :  { %314 = vmatmul.mubr.msk.bf16.gmra.mrb[8].mxu0 %vm113_vm0, %v54_v18  ;;  %335 = vmatmul.mubr.msk.bf16.gmra.mrb[8].mxu1 %vm113_vm0, %v55_v11 }
 0x104   :  { %v160_v26 = vpop.f32.mrb[0].mxu0  ;;  %v190_v27 = vpop.f32.mrb[0].mxu1 }
 0x105   :  { %v161_v28 = vadd.f32 %v160_v26, %v497_v24  ;;  %v191_v29 = vadd.f32 %v190_v27, %v497_v24  ;;  %v162_v30 = vpop.f32.mrb[1].mxu0  ;;  %v192_v31 = vpop.f32.mrb[1].mxu1 }
 0x106   :  { %v163_v33 = vadd.f32 %v162_v30, %v499_v25  ;;  %v193_v34 = vadd.f32 %v192_v31, %v499_v25  ;;  %v164_v35 = vpop.f32.mrb[2].mxu0  ;;  %v194_v36 = vpop.f32.mrb[2].mxu1 }
 0x107   :  { %264 = vst [vmem:[#allocation7] sm:$0xff] %v161_v28  ;;  %282 = vst [vmem:[#allocation7 + $0x90] sm:$0xff] %v191_v29  ;;  %v165_v37 = vadd.f32 %v164_v35, %v497_v24  ;;  %v195_v38 = vadd.f32 %v194_v36, %v497_v24  ;;  %v166_v39 = vpop.f32.mrb[3].mxu0  ;;  %v196_v40 = vpop.f32.mrb[3].mxu1 }
 0x108   :  { %265 = vst [vmem:[#allocation7 + $0x8] sm:$0xff] %v163_v33  ;;  %283 = vst [vmem:[#allocation7 + $0x98] sm:$0xff] %v193_v34  ;;  %v167_v41 = vadd.f32 %v166_v39, %v499_v25  ;;  %v197_v42 = vadd.f32 %v196_v40, %v499_v25 }
 0x109   :  { %267 = vst [vmem:[#allocation7 + $0x18] sm:$0xff] %v165_v37  ;;  %285 = vst [vmem:[#allocation7 + $0xa8] sm:$0xff] %v195_v38 }
 0x10a   :  { %268 = vst [vmem:[#allocation7 + $0x20] sm:$0xff] %v167_v41  ;;  %286 = vst [vmem:[#allocation7 + $0xb0] sm:$0xff] %v197_v42 }
 0x10c   :  { %v170_v44 = vpop.f32.mrb[4].mxu0  ;;  %v332_v45 = vpop.f32.mrb[4].mxu1 }
 0x10d   :  { %v171_v46 = vadd.f32 %v170_v44, %v497_v24  ;;  %v242_v47 = vadd.f32 %v332_v45, %v77_v43  ;;  %v172_v48 = vpop.f32.mrb[5].mxu0  ;;  %v233_v49 = vpop.f32.mrb[5].mxu1 }
 0x10e   :  { %v173_v50 = vadd.f32 %v172_v48, %v499_v25  ;;  %v234_v51 = vadd.f32 %v233_v49, %v77_v43  ;;  %v174_v52 = vpop.f32.mrb[6].mxu0  ;;  %v333_v53 = vpop.f32.mrb[6].mxu1 }
 0x10f   :  { %270 = vst [vmem:[#allocation7 + $0x30] sm:$0xff] %v171_v46  ;;  %272 = vst [vmem:[#allocation7 + $0x40] sm:$0xff] %v242_v47  ;;  %v175_v54 = vadd.f32 %v174_v52, %v497_v24  ;;  %v245_v55 = vadd.f32 %v333_v53, %v77_v43  ;;  %v176_v56 = vpop.f32.mrb[7].mxu0  ;;  %v236_v57 = vpop.f32.mrb[7].mxu1 }
 0x110   :  { %271 = vst [vmem:[#allocation7 + $0x38] sm:$0xff] %v173_v50  ;;  %266 = vst [vmem:[#allocation7 + $0x10] sm:$0xff] %v234_v51  ;;  %v177_v58 = vadd.f32 %v176_v56, %v499_v25  ;;  %v237_v59 = vadd.f32 %v236_v57, %v77_v43 }
 0x111   :  { %273 = vst [vmem:[#allocation7 + $0x48] sm:$0xff] %v175_v54  ;;  %275 = vst [vmem:[#allocation7 + $0x58] sm:$0xff] %v245_v55 }
 0x112   :  { %274 = vst [vmem:[#allocation7 + $0x50] sm:$0xff] %v177_v58  ;;  %269 = vst [vmem:[#allocation7 + $0x28] sm:$0xff] %v237_v59 }
 0x114   :  { %v180_v60 = vpop.f32.mrb[8].mxu0  ;;  %v336_v61 = vpop.f32.mrb[8].mxu1 }
 0x115   :  { %v181_v62 = vadd.f32 %v180_v60, %v497_v24  ;;  %v258_v63 = vadd.f32 %v336_v61, %v77_v43  ;;  %v182_v0 = vpop.f32.mrb[9].mxu0  ;;  %v249_v1 = vpop.f32.mrb[9].mxu1 }
 0x116   :  { %v183_v2 = vadd.f32 %v182_v0, %v499_v25  ;;  %v250_v3 = vadd.f32 %v249_v1, %v77_v43  ;;  %v184_v4 = vpop.f32.mrb[10].mxu0  ;;  %v337_v5 = vpop.f32.mrb[10].mxu1 }
 0x117   :  { %276 = vst [vmem:[#allocation7 + $0x60] sm:$0xff] %v181_v62  ;;  %284 = vst [vmem:[#allocation7 + $0xa0] sm:$0xff] %v258_v63  ;;  %v185_v6 = vadd.f32 %v184_v4, %v497_v24  ;;  %v261_v7 = vadd.f32 %v337_v5, %v77_v43  ;;  %v186_v8 = vpop.f32.mrb[11].mxu0  ;;  %v252_v9 = vpop.f32.mrb[11].mxu1 }
 0x118   :  { %277 = vst [vmem:[#allocation7 + $0x68] sm:$0xff] %v183_v2  ;;  %278 = vst [vmem:[#allocation7 + $0x70] sm:$0xff] %v250_v3  ;;  %v187_v10 = vadd.f32 %v186_v8, %v499_v25  ;;  %v253_v11 = vadd.f32 %v252_v9, %v77_v43 }
 0x119   :  { %279 = vst [vmem:[#allocation7 + $0x78] sm:$0xff] %v185_v6  ;;  %287 = vst [vmem:[#allocation7 + $0xb8] sm:$0xff] %v261_v7 }
 0x11a   :  { %280 = vst [vmem:[#allocation7 + $0x80] sm:$0xff] %v187_v10  ;;  %281 = vst [vmem:[#allocation7 + $0x88] sm:$0xff] %v253_v11 }
 0x11b   :  { %415 = shalt.err (!%p412_p6)
}
 0x11c   :  { %s416_s17 = scalar_lea.hbm %s532_s3, 3072 }
 0x11d   :  { %p417_p7 = scmp.ne.s32.totalorder %s532_s3, %s416_s17  ;;  %p420_p8 = scmp.lt.u32.totalorder %s416_s17, %s532_s3 }
 0x11f   :  { %p422_p9 = pnand %p420_p8, %p417_p7 }
 0x121   :  { %425 = shalt.err (!%p422_p9)
}
 0x122   :  { %s440_s22 = smov 384   ;;  %s441_s23 = smov 24  }
 0x123   :  { %299 = dma.vmem_to_hbm [thread:$0]  %s294_s13, 3072, %s532_s3, [#allocation4], %s440_s22, %s440_s22, %s441_s23  }
 0x124   :  { %430 = dma.done.wait [#allocation4], 3072  }
 0x125   :  { %431 = vsyncadd [#allocation4], 4294964224 }
 0x126   :  { %303 = vsyncpa [#allocation3], 1 }
 0x127   :  { %304 = vsyncpa [#allocation6], 1 }
 0x128   :  { %305 = vsyncpa [#allocation4], 1 }

</bundles_post_ra>
